<compile_context>
chip_gen: v6e
topology: v6e:2x2x1
jax: 0.10.0
libtpu: 0.0.40
codegen_flags: <defaults>
</compile_context>

<pallas_src>
import jax
import jax.numpy as jnp
from jax.experimental import pallas as pl
from jax.experimental.pallas import tpu as pltpu


def _decoder_kernel(x_ref, wb_ref, o_ref):
    # VPU broadcast FMA: (TB, 1) * (1, TN) + (1, TN) -> (TB, TN).
    # Stays entirely in the VALU slots; no MXU involvement for K=1.
    w = wb_ref[0:1, :]
    b = wb_ref[1:2, :]
    o_ref[...] = (x_ref[...] * w + b).astype(o_ref.dtype)


def decoder_forward(x, weight, bias, *, out_dtype=jnp.float32,
                    block_rows=None, block_cols=None,
                    min_pallas_bytes=1 << 18):
    """Pallas equivalent of nn.Linear(1, x_dims) forward.

    x:      (B, 1)        float
    weight: (x_dims, 1)   float  (PyTorch layout: (out_features, in_features))
    bias:   (x_dims,)     float
    returns (B, x_dims)   out_dtype (default float32, matching the module)
    """
    B = x.shape[0]
    x_dims = weight.shape[0]
    out_bytes = jnp.dtype(out_dtype).itemsize

    # ---- tiny-shape fast path: launch overhead >> HBM traffic -------------
    # TODO(synk): in a real model this op should be fused into its
    # producer/consumer kernel instead of being a standalone call.
    if B * x_dims * out_bytes < min_pallas_bytes:
        w_row = weight.reshape(1, x_dims).astype(jnp.float32)
        b_row = bias.reshape(1, x_dims).astype(jnp.float32)
        return (x.astype(jnp.float32) * w_row + b_row).astype(out_dtype)

    # ---- feature tile: full dim if it fits, else 128-aligned tiles --------
    if block_cols is not None:
        TN = min(int(block_cols), x_dims)
        if TN < x_dims:
            TN = max(128, (TN // 128) * 128)
    else:
        TN = x_dims if x_dims <= 8192 else 8192

    # ---- batch tile: ~2 MiB output tile, multiple of 8, capped at 2048 ----
    # (2 MiB x 2 output buffers + lane-padded x buffers + (2, TN) wb buffers
    #  stays ~<= 7 MiB, inside v5e's 16 MiB default scoped VMEM and far under
    #  v6e/v7x budgets; no vmem_limit_bytes override needed.)
    if block_rows is not None:
        tb = int(block_rows)
    else:
        tb = (2 * 1024 * 1024) // (out_bytes * TN)
    tb = min(max(8, (tb // 8) * 8), 2048)
    TB = B if B <= tb else tb   # full-dim block is always layout-legal

    grid = (pl.cdiv(B, TB), pl.cdiv(x_dims, TN))

    # Stack weight row and bias row into one resident (2, x_dims) operand.
    wb = jnp.concatenate(
        [weight.reshape(1, x_dims), bias.reshape(1, x_dims)], axis=0
    ).astype(jnp.float32)
    x32 = x.astype(jnp.float32)

    return pl.pallas_call(
        _decoder_kernel,
        out_shape=jax.ShapeDtypeStruct((B, x_dims), out_dtype),
        grid=grid,
        in_specs=[
            pl.BlockSpec((TB, 1), lambda i, j: (i, 0)),   # per-row scalar x
            pl.BlockSpec((2, TN), lambda i, j: (0, j)),   # stacked [w; b]
        ],
        out_specs=pl.BlockSpec((TB, TN), lambda i, j: (i, j)),
        compiler_params=pltpu.CompilerParams(
            # Both axes independent: shard across TensorCores on v7x.
            dimension_semantics=("parallel", "parallel"),
        ),
        cost_estimate=pl.CostEstimate(
            flops=2 * B * x_dims,
            transcendentals=0,
            bytes_accessed=4 * B + 8 * x_dims + out_bytes * B * x_dims,
        ),
    )(x32, wb)


if __name__ == "__main__":
    key = jax.random.PRNGKey(0)
    k_x, k_w, k_b, k_x2, k_w2, k_b2 = jax.random.split(key, 6)

    # ---- check 1: default small shapes (Decoder(x_dims=32), batch 8) ------
    B, x_dims = 8, 32
    x = jax.random.normal(k_x, (B, 1), dtype=jnp.float32)
    weight = jax.random.normal(k_w, (x_dims, 1), dtype=jnp.float32) * 0.1
    bias = jax.random.normal(k_b, (x_dims,), dtype=jnp.float32) * 0.1

    # Force the Pallas path (default would take the tiny-shape fast path).
    y = decoder_forward(x, weight, bias, min_pallas_bytes=0)
    y = jax.block_until_ready(y)
    y_ref = x @ weight.T + bias
    assert y.shape == (B, x_dims)
    assert jnp.allclose(y, y_ref, atol=1e-5, rtol=1e-5)

    # ---- check 2: ragged B and x_dims with forced small tiles -> exercises
    # partial last-block masking in BOTH grid dims (no wrapper pad/slice) ----
    B2, x_dims2 = 300, 200
    x2 = jax.random.normal(k_x2, (B2, 1), dtype=jnp.float32)
    weight2 = jax.random.normal(k_w2, (x_dims2, 1), dtype=jnp.float32) * 0.1
    bias2 = jax.random.normal(k_b2, (x_dims2,), dtype=jnp.float32) * 0.1

    y2 = decoder_forward(x2, weight2, bias2,
                         block_rows=64, block_cols=128, min_pallas_bytes=0)
    y2 = jax.block_until_ready(y2)
    y2_ref = x2 @ weight2.T + bias2
    assert y2.shape == (B2, x_dims2)
    assert jnp.allclose(y2, y2_ref, atol=1e-5, rtol=1e-5)

    print("KERNEL_OK")
</pallas_src>

<mosaic_0001>
module attributes {stable_mosaic.version = 11 : i64} {
  func.func @_decoder_kernel(%arg0: i32, %arg1: i32, %arg2: memref<8x1xf32, #tpu.memory_space<vmem>>, %arg3: memref<2x32xf32, #tpu.memory_space<vmem>>, %arg4: memref<8x32xf32, #tpu.memory_space<vmem>>) attributes {dimension_semantics = [#tpu.dimension_semantics<parallel>, #tpu.dimension_semantics<parallel>], iteration_bounds = array<i64: 1, 1>, scalar_prefetch = 0 : i64, scratch_operands = 0 : i64, tpu.core_type = #tpu.core_type<tc>, window_params = [{transform_indices = @transform_0, window_bounds = array<i64: 8, 1>}, {transform_indices = @transform_1, window_bounds = array<i64: 2, 32>}, {transform_indices = @transform_2, window_bounds = array<i64: 8, 32>}]} {
    %c0 = arith.constant 0 : index
    %c0_0 = arith.constant 0 : index
    %0 = vector.load %arg3[%c0, %c0_0] : memref<2x32xf32, #tpu.memory_space<vmem>>, vector<1x32xf32>
    %c1 = arith.constant 1 : index
    %c0_1 = arith.constant 0 : index
    %1 = vector.load %arg3[%c1, %c0_1] : memref<2x32xf32, #tpu.memory_space<vmem>>, vector<1x32xf32>
    %c0_2 = arith.constant 0 : index
    %c0_3 = arith.constant 0 : index
    %2 = vector.load %arg2[%c0_2, %c0_3] : memref<8x1xf32, #tpu.memory_space<vmem>>, vector<8x1xf32>
    %3 = vector.broadcast %2 : vector<8x1xf32> to vector<8x32xf32>
    %4 = vector.broadcast %0 : vector<1x32xf32> to vector<8x32xf32>
    %5 = arith.mulf %3, %4 : vector<8x32xf32>
    %6 = vector.broadcast %1 : vector<1x32xf32> to vector<8x32xf32>
    %7 = arith.addf %5, %6 : vector<8x32xf32>
    %c0_4 = arith.constant 0 : index
    %c0_5 = arith.constant 0 : index
    %8 = vector.load %arg4[%c0_4, %c0_5] : memref<8x32xf32, #tpu.memory_space<vmem>>, vector<8x32xf32>
    tpu.vector_store %arg4[%c0_4, %c0_5], %7 {strides = array<i32>} : memref<8x32xf32, #tpu.memory_space<vmem>>, vector<8x32xf32>,
    return
  }
  func.func @transform_0(%arg0: i32, %arg1: i32) -> (i32, i32) {
    %c0_i32 = arith.constant 0 : i32
    %c0_i32_0 = arith.constant 0 : i32
    return %arg0, %c0_i32 : i32, i32
  }
  func.func @transform_1(%arg0: i32, %arg1: i32) -> (i32, i32) {
    %c0_i32 = arith.constant 0 : i32
    %c0_i32_0 = arith.constant 0 : i32
    return %c0_i32, %arg1 : i32, i32
  }
  func.func @transform_2(%arg0: i32, %arg1: i32) -> (i32, i32) {
    %c0_i32 = arith.constant 0 : i32
    return %arg0, %arg1 : i32, i32
  }
}

</mosaic_0001>

<bundles_post_ra>
// kernel: tpu_custom_call.1
= control target key start
LH: loop header
LB: loop body
LE: loop exit
PB: predicated region body
PF: predicated region fallthrough
CT: control target
= control target key end

     0   :  { %v73_v1 = vmov 0   ;;  %s102_s0 = inlined_call_operand.vmem [shape: f32[8,1], index: 0, kind: input, shape index: {}]   ;;  %s103_s1 = inlined_call_operand.vmem [shape: f32[2,32], index: 1, kind: input, shape index: {}]   ;;  %s104_s2 = inlined_call_operand.hbm [shape: f32[8,32], index: 2, kind: output, shape index: {}]  }
   0x1   :  { %v14_v0 = vld [vmem:[%s102_s0] sm:$0xff]  ;;  %50 = vset.pattern.permute.xlu0 %v73_v1 }
   0x2   :  { %7 = vsyncpa [#allocation3], 0  ;;  %17 = vperm.xlu0 %50, %v14_v0   ;;  %v46_v2 = vld [vmem:[%s103_s1] ss:$0 sm:$0xff]  ;;  %v47_v4 = vld [vmem:[%s103_s1 + $0x1] ss:$0 sm:$0xff] }
   0x3   :  { %s74_s15 = smov [#allocation2]   ;;  %vm30_vm0 = vcmask 261120  }
   0x4   :  { %s38_s16 = sshll.u32 %s74_s15, 4  ;;  %s39_s16 = int_to_ptr.vmem [resolvable:$true] %s38_s16 }
   0x5   :  { %s51_s0 = scalar_lea.vmem %s39_s16, 128  ;;  %p56_p1 = scmp.lt.s32.totalorder %s39_s16, %s39_s16 }
   0x6   :  { %p52_p0 = scmp.ne.s32.totalorder %s39_s16, %s51_s0  ;;  %p57_p2 = scmp.lt.s32.totalorder %s51_s0, %s51_s0 }
   0x8   :  { %p58_p3 = por %p57_p2, %p56_p1 }
   0xa   :  { %p59_p4 = pnand %p58_p3, %p52_p0 }
  0x7d   :  { %v18_v3 = vpop.permute.xlu0 %17 }
  0x7e   :  { %v24_v5 = vmul.f32 %v46_v2, %v18_v3 }
  0x80   :  { %v29_v6 = vadd.f32 %v47_v4, %v24_v5 }
  0x82   :  { %31 = vst.msk [vmem:[#allocation2] sm:$0xff] %vm30_vm0, %v29_v6 }
  0x83   :  { %62 = shalt.err (!%p59_p4)
}
  0x84   :  { %41 = dma.vmem_to_hbm [thread:$0]  %s39_s16, 128, %s104_s2, [#allocation3]  }
  0x85   :  { %71 = dma.done.wait [#allocation3], 128  }
  0x86   :  { %72 = vsyncadd [#allocation3], 4294967168 }
  0x87   :  { %45 = vsyncpa [#allocation3], 1 }

</bundles_post_ra>
